<compile_context>
chip_gen: v7x
topology: tpu7x:2x2x1
jax: 0.10.0
libtpu: 0.0.40
codegen_flags: <defaults>
</compile_context>

<pallas_src>
import functools

import jax
import jax.numpy as jnp
from jax.experimental import pallas as pl
from jax.experimental.pallas import tpu as pltpu


def _encoder_kernel(ops_ref, adj_ref, w0_ref, b0_ref, w1_ref, b1_ref,
                    *out_refs, normalize, reg_emb):
    if reg_emb:
        x_out_ref, norm_ref = out_refs
    else:
        (x_out_ref,) = out_refs

    G, N, Din = ops_ref.shape

    adj = adj_ref[...]                                   # (G, N, N)
    if normalize:
        # normalize_adj: divide each row by its sum (matches the PyTorch
        # module; no zero guard, same as the reference).  One reciprocal per
        # row + broadcast multiply instead of N divides per row.
        rowsum = jnp.sum(adj, axis=-1, keepdims=True)    # (G, N, 1)
        adj = adj * (1.0 / rowsum)

    # Stack the G graphs' node features so the feature transform of each layer
    # is a single (G*N, D) @ (D, D') MXU matmul (leading-dim reshapes only).
    x2d = ops_ref[...].reshape(G * N, Din)
    for w_ref, b_ref in ((w0_ref, b0_ref), (w1_ref, b1_ref)):
        d_out = w_ref.shape[-1]
        support = jnp.dot(x2d, w_ref[...],
                          preferred_element_type=jnp.float32)      # (G*N, d')
        support = support.reshape(G, N, d_out)
        y = jnp.einsum("gij,gjd->gid", adj, support,
                       preferred_element_type=jnp.float32)         # (G, N, d')
        x2d = y.reshape(G * N, d_out) + b_ref[...]                  # + (1, d')

    d_out = x2d.shape[-1]
    x3 = x2d.reshape(G, N, d_out)
    x_out_ref[...] = x3.astype(x_out_ref.dtype)

    if reg_emb:
        emb = jnp.mean(x3, axis=1)                                  # (G, d')
        nrm = jnp.sqrt(jnp.sum(emb * emb, axis=-1, keepdims=True))  # (G, 1)
        norm_ref[...] = nrm.astype(norm_ref.dtype)


def encoder_forward(ops, adj, params, *, normalize=True, reg_emb=True,
                    graphs_per_block=128):
    """params = [(W0, b0), (W1, b1)] with b_k shaped (1, D_{k+1})."""
    B, N, Din = ops.shape
    (w0, b0), (w1, b1) = params
    Dh = w0.shape[1]
    Dout = w1.shape[1]

    # Graphs per grid step.  With more than one grid step the leading block
    # dim of the 2-D norms output must be a multiple of 8.
    if B <= graphs_per_block:
        G = B
    else:
        G = max((graphs_per_block // 8) * 8, 8)
    num_steps = pl.cdiv(B, G)
    Bp = num_steps * G
    if Bp != B:
        pad = Bp - B
        ops = jnp.concatenate(
            [ops, jnp.zeros((pad, N, Din), ops.dtype)], axis=0)
        # Pad adjacency with ones so row-normalization of the dummy graphs
        # never divides by zero (their outputs are sliced off anyway).
        adj = jnp.concatenate(
            [adj, jnp.ones((pad, N, N), adj.dtype)], axis=0)

    kernel = functools.partial(_encoder_kernel, normalize=normalize,
                               reg_emb=reg_emb)

    out_shape = [jax.ShapeDtypeStruct((Bp, N, Dout), jnp.float32)]
    out_specs = [pl.BlockSpec((G, N, Dout), lambda i: (i, 0, 0))]
    if reg_emb:
        out_shape.append(jax.ShapeDtypeStruct((Bp, 1), jnp.float32))
        out_specs.append(pl.BlockSpec((G, 1), lambda i: (i, 0)))

    outs = pl.pallas_call(
        kernel,
        out_shape=tuple(out_shape),
        grid_spec=pltpu.PrefetchScalarGridSpec(
            num_scalar_prefetch=0,
            grid=(num_steps,),
            in_specs=[
                pl.BlockSpec((G, N, Din), lambda i: (i, 0, 0)),  # ops block
                pl.BlockSpec((G, N, N),   lambda i: (i, 0, 0)),  # adj block
                pl.BlockSpec((Din, Dh),   lambda i: (0, 0)),     # W0 (resident)
                pl.BlockSpec((1, Dh),     lambda i: (0, 0)),     # b0
                pl.BlockSpec((Dh, Dout),  lambda i: (0, 0)),     # W1
                pl.BlockSpec((1, Dout),   lambda i: (0, 0)),     # b1
            ],
            out_specs=out_specs,
        ),
        compiler_params=pltpu.CompilerParams(
            # No cross-step dependence -> shard graph blocks across
            # TensorCores (2x on v7x megacore; harmless on v5e/v6e).
            dimension_semantics=("parallel",),
        ),
    )(ops, adj, w0, b0, w1, b1)

    if reg_emb:
        x_out, norms = outs
        x_out = x_out[:B]
        emb_loss = jnp.mean(norms[:B, 0])
    else:
        x_out = outs[0][:B]
        emb_loss = jnp.float32(0.0)
    return x_out, emb_loss


def _reference_forward(ops, adj, params, *, normalize=True, reg_emb=True):
    """Pure-JAX reference mirroring the PyTorch forward (eval mode)."""
    if normalize:
        adj = adj / jnp.sum(adj, axis=2, keepdims=True)
    x = ops
    for w, b in params:
        x = jnp.einsum("bij,bjd->bid", adj, jnp.einsum("bnd,de->bne", x, w)) + b
    if reg_emb:
        emb = x.mean(axis=1)
        loss = jnp.mean(jnp.linalg.norm(emb, axis=1))
    else:
        loss = jnp.float32(0.0)
    return x, loss


if __name__ == "__main__":
    # Small shapes consistent with the module: B graphs, N nodes,
    # dims = [16, 32, 16] -> two GraphConvolution layers.
    B, N = 10, 8
    dims = [16, 32, 16]

    key = jax.random.PRNGKey(0)
    k_ops, k_adj, k_w0, k_w1 = jax.random.split(key, 4)

    ops = jax.random.normal(k_ops, (B, N, dims[0]), dtype=jnp.float32)
    # strictly positive adjacency so row-normalization never divides by zero
    adj = jax.random.uniform(k_adj, (B, N, N), dtype=jnp.float32,
                             minval=0.1, maxval=1.0)

    def xavier(k, fan_in, fan_out):
        limit = jnp.sqrt(6.0 / (fan_in + fan_out))
        return jax.random.uniform(k, (fan_in, fan_out), dtype=jnp.float32,
                                  minval=-limit, maxval=limit)

    params = [
        (xavier(k_w0, dims[0], dims[1]), jnp.zeros((1, dims[1]), jnp.float32)),
        (xavier(k_w1, dims[1], dims[2]), jnp.zeros((1, dims[2]), jnp.float32)),
    ]

    # Multi-step grid with batch padding (B=10 -> two blocks of G=8).
    x_out, emb_loss = encoder_forward(ops, adj, params, normalize=True,
                                      reg_emb=True, graphs_per_block=8)
    jax.block_until_ready((x_out, emb_loss))
    x_ref, loss_ref = _reference_forward(ops, adj, params,
                                         normalize=True, reg_emb=True)
    assert x_out.shape == x_ref.shape
    assert jnp.allclose(x_out, x_ref, atol=1e-4, rtol=1e-4)
    assert jnp.allclose(emb_loss, loss_ref, atol=1e-4, rtol=1e-4)

    # Single-step grid, no normalization, no embedding regularization.
    x_out2, loss2 = encoder_forward(ops, adj, params, normalize=False,
                                    reg_emb=False)
    jax.block_until_ready((x_out2, loss2))
    x_ref2, loss_ref2 = _reference_forward(ops, adj, params,
                                           normalize=False, reg_emb=False)
    assert jnp.allclose(x_out2, x_ref2, atol=1e-4, rtol=1e-4)
    assert jnp.allclose(loss2, loss_ref2, atol=1e-6)

    print("KERNEL_OK")
</pallas_src>

<mosaic_0001>
module attributes {stable_mosaic.version = 11 : i64} {
  func.func @_encoder_kernel(%arg0: i32, %arg1: memref<8x8x16xf32, #tpu.memory_space<vmem>>, %arg2: memref<8x8x8xf32, #tpu.memory_space<vmem>>, %arg3: memref<16x32xf32, #tpu.memory_space<vmem>>, %arg4: memref<1x32xf32, #tpu.memory_space<vmem>>, %arg5: memref<32x16xf32, #tpu.memory_space<vmem>>, %arg6: memref<1x16xf32, #tpu.memory_space<vmem>>, %arg7: memref<8x8x16xf32, #tpu.memory_space<vmem>>, %arg8: memref<8x1xf32, #tpu.memory_space<vmem>>) attributes {dimension_semantics = [#tpu.dimension_semantics<parallel>], iteration_bounds = array<i64: 2>, scalar_prefetch = 0 : i64, scratch_operands = 0 : i64, tpu.core_type = #tpu.core_type<tc>, window_params = [{transform_indices = @transform_0, window_bounds = array<i64: 8, 8, 16>}, {transform_indices = @transform_1, window_bounds = array<i64: 8, 8, 8>}, {pipeline_mode = #tpu.pipeline_mode<synchronous>, transform_indices = @transform_2, window_bounds = array<i64: 16, 32>}, {pipeline_mode = #tpu.pipeline_mode<synchronous>, transform_indices = @transform_3, window_bounds = array<i64: 1, 32>}, {pipeline_mode = #tpu.pipeline_mode<synchronous>, transform_indices = @transform_4, window_bounds = array<i64: 32, 16>}, {pipeline_mode = #tpu.pipeline_mode<synchronous>, transform_indices = @transform_5, window_bounds = array<i64: 1, 16>}, {transform_indices = @transform_6, window_bounds = array<i64: 8, 8, 16>}, {transform_indices = @transform_7, window_bounds = array<i64: 8, 1>}]} {
    %c0 = arith.constant 0 : index
    %c0_0 = arith.constant 0 : index
    %c0_1 = arith.constant 0 : index
    %0 = vector.load %arg2[%c0, %c0_0, %c0_1] : memref<8x8x8xf32, #tpu.memory_space<vmem>>, vector<8x8x8xf32>
    %cst = arith.constant dense<0.000000e+00> : vector<8x8xf32>
    %1 = vector.multi_reduction <add>, %0, %cst [2] : vector<8x8x8xf32> to vector<8x8xf32>
    %2 = vector.shape_cast %1 : vector<8x8xf32> to vector<8x8x1xf32>
    %cst_2 = arith.constant 1.000000e+00 : f32
    %3 = vector.broadcast %cst_2 : f32 to vector<8x8x1xf32>
    %4 = arith.divf %3, %2 : vector<8x8x1xf32>
    %5 = vector.broadcast %4 : vector<8x8x1xf32> to vector<8x8x8xf32>
    %6 = arith.mulf %0, %5 : vector<8x8x8xf32>
    %c0_3 = arith.constant 0 : index
    %c0_4 = arith.constant 0 : index
    %c0_5 = arith.constant 0 : index
    %7 = vector.load %arg1[%c0_3, %c0_4, %c0_5] : memref<8x8x16xf32, #tpu.memory_space<vmem>>, vector<8x8x16xf32>
    %8 = vector.shape_cast %7 : vector<8x8x16xf32> to vector<64x16xf32>
    %c0_6 = arith.constant 0 : index
    %c0_7 = arith.constant 0 : index
    %9 = vector.load %arg3[%c0_6, %c0_7] : memref<16x32xf32, #tpu.memory_space<vmem>>, vector<16x32xf32>
    %cst_8 = arith.constant dense<0.000000e+00> : vector<64x32xf32>
    %10 = tpu.matmul %8, %9, %cst_8 {dimension_numbers = #tpu.dot_dimension_numbers<[1], [0], [0], [1], [0, 0, 1, 1], [], []>} : vector<64x16xf32>, vector<16x32xf32>, vector<64x32xf32> -> vector<64x32xf32>
    %11 = vector.shape_cast %10 : vector<64x32xf32> to vector<8x8x32xf32>
    "tpu.trace_start"() <{level = 10 : i32, message = "gij,gjd->gid"}> : () -> ()
    %cst_9 = arith.constant dense<0.000000e+00> : vector<8x8x32xf32>
    %12 = tpu.matmul %6, %11, %cst_9 {dimension_numbers = #tpu.dot_dimension_numbers<[2], [1], [1], [2], [0, 0, 0, 1, 1, 2], [0], [0]>} : vector<8x8x8xf32>, vector<8x8x32xf32>, vector<8x8x32xf32> -> vector<8x8x32xf32>
    "tpu.trace_stop"() : () -> ()
    %13 = vector.shape_cast %12 : vector<8x8x32xf32> to vector<64x32xf32>
    %c0_10 = arith.constant 0 : index
    %c0_11 = arith.constant 0 : index
    %14 = vector.load %arg4[%c0_10, %c0_11] : memref<1x32xf32, #tpu.memory_space<vmem>>, vector<1x32xf32>
    %15 = vector.broadcast %14 : vector<1x32xf32> to vector<64x32xf32>
    %16 = arith.addf %13, %15 : vector<64x32xf32>
    %c0_12 = arith.constant 0 : index
    %c0_13 = arith.constant 0 : index
    %17 = vector.load %arg5[%c0_12, %c0_13] : memref<32x16xf32, #tpu.memory_space<vmem>>, vector<32x16xf32>
    %cst_14 = arith.constant dense<0.000000e+00> : vector<64x16xf32>
    %18 = tpu.matmul %16, %17, %cst_14 {dimension_numbers = #tpu.dot_dimension_numbers<[1], [0], [0], [1], [0, 0, 1, 1], [], []>} : vector<64x32xf32>, vector<32x16xf32>, vector<64x16xf32> -> vector<64x16xf32>
    %19 = vector.shape_cast %18 : vector<64x16xf32> to vector<8x8x16xf32>
    "tpu.trace_start"() <{level = 10 : i32, message = "gij,gjd->gid"}> : () -> ()
    %cst_15 = arith.constant dense<0.000000e+00> : vector<8x8x16xf32>
    %20 = tpu.matmul %6, %19, %cst_15 {dimension_numbers = #tpu.dot_dimension_numbers<[2], [1], [1], [2], [0, 0, 0, 1, 1, 2], [0], [0]>} : vector<8x8x8xf32>, vector<8x8x16xf32>, vector<8x8x16xf32> -> vector<8x8x16xf32>
    "tpu.trace_stop"() : () -> ()
    %21 = vector.shape_cast %20 : vector<8x8x16xf32> to vector<64x16xf32>
    %c0_16 = arith.constant 0 : index
    %c0_17 = arith.constant 0 : index
    %22 = vector.load %arg6[%c0_16, %c0_17] : memref<1x16xf32, #tpu.memory_space<vmem>>, vector<1x16xf32>
    %23 = vector.broadcast %22 : vector<1x16xf32> to vector<64x16xf32>
    %24 = arith.addf %21, %23 : vector<64x16xf32>
    %25 = vector.shape_cast %24 : vector<64x16xf32> to vector<8x8x16xf32>
    %c0_18 = arith.constant 0 : index
    %c0_19 = arith.constant 0 : index
    %c0_20 = arith.constant 0 : index
    %26 = vector.load %arg7[%c0_18, %c0_19, %c0_20] : memref<8x8x16xf32, #tpu.memory_space<vmem>>, vector<8x8x16xf32>
    tpu.vector_store %arg7[%c0_18, %c0_19, %c0_20], %25 {strides = array<i32>} : memref<8x8x16xf32, #tpu.memory_space<vmem>>, vector<8x8x16xf32>,
    %cst_21 = arith.constant dense<0.000000e+00> : vector<8x16xf32>
    %27 = vector.multi_reduction <add>, %25, %cst_21 [1] : vector<8x8x16xf32> to vector<8x16xf32>
    %cst_22 = arith.constant 8.000000e+00 : f32
    %28 = vector.broadcast %cst_22 : f32 to vector<8x16xf32>
    %29 = arith.divf %27, %28 : vector<8x16xf32>
    %30 = arith.mulf %29, %29 : vector<8x16xf32>
    %cst_23 = arith.constant dense<0.000000e+00> : vector<8xf32>
    %31 = vector.multi_reduction <add>, %30, %cst_23 [1] : vector<8x16xf32> to vector<8xf32>
    %32 = vector.shape_cast %31 : vector<8xf32> to vector<8x1xf32>
    %33 = math.sqrt %32 : vector<8x1xf32>
    %c0_24 = arith.constant 0 : index
    %c0_25 = arith.constant 0 : index
    %34 = vector.load %arg8[%c0_24, %c0_25] : memref<8x1xf32, #tpu.memory_space<vmem>>, vector<8x1xf32>
    tpu.vector_store %arg8[%c0_24, %c0_25], %33 {strides = array<i32>} : memref<8x1xf32, #tpu.memory_space<vmem>>, vector<8x1xf32>,
    return
  }
  func.func @transform_0(%arg0: i32) -> (i32, i32, i32) {
    %c0_i32 = arith.constant 0 : i32
    %c0_i32_0 = arith.constant 0 : i32
    %c0_i32_1 = arith.constant 0 : i32
    return %arg0, %c0_i32, %c0_i32_0 : i32, i32, i32
  }
  func.func @transform_1(%arg0: i32) -> (i32, i32, i32) {
    %c0_i32 = arith.constant 0 : i32
    %c0_i32_0 = arith.constant 0 : i32
    %c0_i32_1 = arith.constant 0 : i32
    return %arg0, %c0_i32, %c0_i32_0 : i32, i32, i32
  }
  func.func @transform_2(%arg0: i32) -> (i32, i32) {
    %c0_i32 = arith.constant 0 : i32
    %c0_i32_0 = arith.constant 0 : i32
    %c0_i32_1 = arith.constant 0 : i32
    return %c0_i32, %c0_i32_0 : i32, i32
  }
  func.func @transform_3(%arg0: i32) -> (i32, i32) {
    %c0_i32 = arith.constant 0 : i32
    %c0_i32_0 = arith.constant 0 : i32
    %c0_i32_1 = arith.constant 0 : i32
    return %c0_i32, %c0_i32_0 : i32, i32
  }
  func.func @transform_4(%arg0: i32) -> (i32, i32) {
    %c0_i32 = arith.constant 0 : i32
    %c0_i32_0 = arith.constant 0 : i32
    %c0_i32_1 = arith.constant 0 : i32
    return %c0_i32, %c0_i32_0 : i32, i32
  }
  func.func @transform_5(%arg0: i32) -> (i32, i32) {
    %c0_i32 = arith.constant 0 : i32
    %c0_i32_0 = arith.constant 0 : i32
    %c0_i32_1 = arith.constant 0 : i32
    return %c0_i32, %c0_i32_0 : i32, i32
  }
  func.func @transform_6(%arg0: i32) -> (i32, i32, i32) {
    %c0_i32 = arith.constant 0 : i32
    %c0_i32_0 = arith.constant 0 : i32
    %c0_i32_1 = arith.constant 0 : i32
    return %arg0, %c0_i32, %c0_i32_0 : i32, i32, i32
  }
  func.func @transform_7(%arg0: i32) -> (i32, i32) {
    %c0_i32 = arith.constant 0 : i32
    %c0_i32_0 = arith.constant 0 : i32
    return %arg0, %c0_i32 : i32, i32
  }
}

</mosaic_0001>

<bundles_post_ra>
// kernel: tpu_custom_call.1
= control target key start
LH: loop header
LB: loop body
LE: loop exit
PB: predicated region body
PF: predicated region fallthrough
CT: control target
= control target key end

     0   :  { %13 = vsyncpa [#allocation3], 0  ;;  %s2788_s0 = inlined_call_operand.vmem [shape: f32[16,8,16], index: 0, kind: input, shape index: {}]   ;;  %s2789_s1 = inlined_call_operand.vmem [shape: f32[16,8,8], index: 1, kind: input, shape index: {}]   ;;  %s2790_s2 = inlined_call_operand.vmem [shape: f32[16,32], index: 2, kind: input, shape index: {}]   ;;  %s2791_s3 = inlined_call_operand.vmem [shape: f32[1,32], index: 3, kind: input, shape index: {}]   ;;  %s2792_s4 = inlined_call_operand.vmem [shape: f32[32,16], index: 4, kind: input, shape index: {}]   ;;  %s2793_s5 = inlined_call_operand.vmem [shape: f32[1,16], index: 5, kind: input, shape index: {}]   ;;  %s2794_s6 = inlined_call_operand.hbm [shape: f32[16,8,16], index: 6, kind: output, shape index: {0}]   ;;  %s2795_s7 = inlined_call_operand.vmem [shape: f32[16,1], index: 7, kind: output, shape index: {1}]  }
   0x1   :  { %15 = vsyncpa [#allocation3 + $0x1], 0  ;;  %s2455_s24 = smov 0   ;;  %s2457_s25 = smov 0  }
   0x2   :  { %s2459_s26 = smov 0   ;;  %s2461_s27 = smov 0  }
   0x3 LB: > { %s2476_s28 = sadd.s32 4294967295, %s2408_s27   ;;  %s2053_s29 = sadd.s32 4294967294, %s2408_s27   ;;  %s2408_s27 = sphi %s2461_s27, %s2801_s27   ;;  %s2404_s26 = sphi %s2459_s26, %s2800_s26   ;;  %s2400_s25 = sphi %s2457_s25, %s2799_s25   ;;  %s2396_s24 = sphi %s2455_s24, %s2798_s24  }
   0x4   : > { %s2480_s30 = sadd.s32 1, %s2408_s27   ;;  %s164_s8 = sadd.s32 1, %s2404_s26 }
   0x5   : > { %s161_s9 = ssub.s32 %s2408_s27, %s2480_s30  ;;  %p174_p0 = scmp.ne.s32.totalorder %s2404_s26, %s2400_s25 }
   0x6   : > { %p162_p1 = scmp.eq.s32.totalorder %s161_s9, 0  ;;  %p175_p2 = scmp.eq.s32.totalorder %s2476_s28, 1 }
   0x7   : > { %p180_p3 = scmp.ne.s32.totalorder %s2400_s25, %s2396_s24  ;;  %p181_p4 = scmp.eq.s32.totalorder %s2053_s29, 1 }
   0x8   : > { %s2491_s10 = scalar_select %p162_p1, %s2404_s26, %s164_s8  }
   0x9   : > { %p2493_p5 = por %p175_p2, %p174_p0  ;;  %p2497_p6 = por %p181_p4, %p180_p3 }
   0xa   : > { %p2056_p7 = scmp.ge.s32.totalorder %s2408_s27, 1  ;;  %p255_p8 = scmp.lt.s32.totalorder %s2408_s27, 3 }
   0xc   : > { %p256_p9 = pnand %p2056_p7, %p255_p8 }
   0xd   : > { %v378_v0 = vld [vmem:[%s2790_s2] sm:$0xff] (!%p256_p9)  ;;  %v379_v1 = vld [vmem:[%s2790_s2 + $0x8] sm:$0xff] (!%p256_p9)  ;;  %s2058_s17 = sshll.u32 (!%p256_p9), %s2476_s28, 3  ;;  %vm380_vm0 = vcmask (!%p256_p9), 130048   ;;  %vm321_vm1 = vcmask (!%p256_p9), 64512   ;;  %v2410_v27 = vmov (!%p256_p9), 0.0  }
   0xe   : > { %259 = sbr.rel (%p256_p9) target bundleno = 1085 (0x43d), region = 44  ;;  %v2273_v2 = vpack.c.bf16 (!%p256_p9), %v379_v1, %v378_v0  ;;  %p297_p10 = scmp.lt.s32.totalorder (!%p256_p9), %s2058_s17, 15  ;;  %2173 = vmatprep.subr.mxu1 (!%p256_p9), %v2410_v27  ;;  %vm2411_vm2 = vmmov (!%p256_p9), 0   ;;  %v1109_v57 = vld [vmem:[%s2792_s4] sm:$0xff] (!%p256_p9)  ;;  %v1110_v58 = vld [vmem:[%s2792_s4 + $0x8] sm:$0xff] (!%p256_p9)  ;;  %v1111_v63 = vld [vmem:[%s2792_s4 + $0x10] sm:$0xff] (!%p256_p9) }
   0xf   : > { %2175 = vmatprep.mubr.msk.f32.mxu1 (!%p256_p9), %vm2411_vm2, %v2410_v27  ;;  %v2277_v61 = vpack.c.bf16 (!%p256_p9), %v1110_v58, %v1109_v57  ;;  %v1112_v0 = vld [vmem:[%s2792_s4 + $0x18] sm:$0xff] (!%p256_p9)  ;;  %vm1113_vm3 = vcmask (!%p256_p9), 261120   ;;  %vm1907_vm4 = vcmask (!%p256_p9), 1041409   ;;  %vm1909_vm5 = vcmask (!%p256_p9), 1042434   ;;  %s2102_s9 = sshll.u32 (!%p256_p9), %s2476_s28, 10  ;;  %s2412_s19 = smov (!%p256_p9), [#allocation2]  }
  0x10   : > { %2274 = vmatprep.subr.bf16.mxu0 (!%p256_p9), %v2273_v2  ;;  %v2281_v1 = vpack.c.bf16 (!%p256_p9), %v1112_v0, %v1111_v63  ;;  %vm1911_vm6 = vcmask (!%p256_p9), 1043459   ;;  %vm1913_vm7 = vcmask (!%p256_p9), 1044484   ;;  %vm1915_vm8 = vcmask (!%p256_p9), 1045509   ;;  %s2736_s16 = scalar_lea.hbm (!%p256_p9), %s2794_s6, %s2102_s9  ;;  %s2350_s20 = sshll.u32 (!%p256_p9), %s2412_s19, 4  ;;  %s2351_s20 = int_to_ptr.vmem [resolvable:$false] %s2350_s20 }
  0x11   : > { %2276 = vmatpush3.bf16.msra.mxu0 (!%p256_p9), %v2273_v2  ;;  %v2079_v2 = vld [vmem:[%s2791_s3] ss:$0 sm:$0xff] (!%p256_p9)  ;;  %vm1917_vm9 = vcmask (!%p256_p9), 1046534   ;;  %vm1919_vm10 = vcmask (!%p256_p9), 1047559  }
  0x12   : > { %2198 = vmatprep.subr.mxu0 (!%p256_p9), %v2410_v27 }
  0x15   : > { %s2803_s17 = smov (!%p297_p10, %s2058_s17), 15 }
  0x16   : > { %s2059_s18 = sshll.u32 %s2803_s17, 3 }
  0x17   : > { %s2513_s21 = scalar_lea.vmem %s2788_s0, %s2059_s18  ;;  %s2518_s29 = scalar_lea.vmem %s2789_s1, %s2059_s18 }
  0x18   : > { %v370_v3 = vld [vmem:[%s2513_s21] sm:$0xff]  ;;  %v371_v4 = vld [vmem:[%s2513_s21 + $0x8] sm:$0xff]  ;;  %v372_v5 = vld [vmem:[%s2513_s21 + $0x10] sm:$0xff] }
  0x19   : > { %2161 = vmatprep.mubr.msk.f32.mxu0 %vm380_vm0, %v370_v3  ;;  %v373_v6 = vld [vmem:[%s2513_s21 + $0x18] sm:$0xff]  ;;  %v313_v7 = vld [vmem:[%s2518_s29] sm:$0xff]  ;;  %v314_v9 = vld [vmem:[%s2518_s29 + $0x8] sm:$0xff] }
  0x1a   : > { %2162 = vmatmul.mubr.msk.f32.vlgmr.msra.gmra.mrb[0].mxu0 %vm380_vm0, %v371_v4  ;;  %v322_v8 = vsel %vm321_vm1, %v313_v7, 0.0  ;;  %v2531_v10 = vld [vmem:[%s2518_s29 + $0x10] sm:$0xff]  ;;  %v2534_v11 = vld [vmem:[%s2518_s29 + $0x18] sm:$0xff]  ;;  %v374_v12 = vld [vmem:[%s2513_s21 + $0x20] sm:$0xff]  ;;  %v325_v14 = vsel %vm321_vm1, %v314_v9, 0.0 }
  0x1b   : > { %2164 = vmatprep.mubr.msk.f32.mxu0 %vm380_vm0, %v372_v5  ;;  %323 = vadd.xlane.f32.xlu0 %v322_v8  ;;  %v328_v13 = vsel %vm321_vm1, %v2531_v10, 0.0  ;;  %v331_v15 = vsel %vm321_vm1, %v2534_v11, 0.0  ;;  %v2544_v16 = vld [vmem:[%s2518_s29 + $0x20] sm:$0xff]  ;;  %v375_v17 = vld [vmem:[%s2513_s21 + $0x28] sm:$0xff]  ;;  %v376_v19 = vld [vmem:[%s2513_s21 + $0x30] sm:$0xff] }
  0x1c   : > { %329 = vadd.xlane.f32.xlu1 %v328_v13  ;;  %v318_v18 = vld [vmem:[%s2518_s29 + $0x28] sm:$0xff]  ;;  %v334_v20 = vsel %vm321_vm1, %v2544_v16, 0.0  ;;  %v2555_v22 = vld [vmem:[%s2518_s29 + $0x30] sm:$0xff]  ;;  %v377_v23 = vld [vmem:[%s2513_s21 + $0x38] sm:$0xff]  ;;  %s287_s21 = sand.u32 1, %s2400_s25  }
  0x1d   : > { %v337_v21 = vsel %vm321_vm1, %v318_v18, 0.0  ;;  %v320_v24 = vld [vmem:[%s2518_s29 + $0x38] sm:$0xff]  ;;  %v340_v25 = vsel %vm321_vm1, %v2555_v22, 0.0  ;;  %s2057_s22 = sshll.u32 %s287_s21, 6  ;;  %s2742_s17 = scalar_lea.sflag [#allocation3], %s287_s21 }
  0x1e   : > { %2165 = vmatmul.mubr.msk.f32.gmra.mrb[2].mxu0 %vm380_vm0, %v373_v6  ;;  %v343_v26 = vsel %vm321_vm1, %v320_v24, 0.0  ;;  %s2696_s8 = scalar_lea.vmem [#allocation2], %s2057_s22  ;;  %s2352_s22 = scalar_lea.vmem %s2351_s20, 2048 }
  0x1f   : > { %2167 = vmatprep.mubr.msk.f32.mxu0 %vm380_vm0, %v374_v12  ;;  %326 = vadd.xlane.f32.xlu0 %v325_v14  ;;  %s1952_s13 = sshll.u32 %s2696_s8, 4  ;;  %s2738_s13 = int_to_ptr.vmem [resolvable:$true] %s1952_s13 }
  0x20   : > { %332 = vadd.xlane.f32.xlu1 %v331_v15  ;;  %s2346_s18 = scalar_lea.vmem %s2738_s13, 1024  ;;  %p2353_p0 = scmp.lt.s32.totalorder %s2738_s13, %s2351_s20 }
  0x21   : > { %p2347_p11 = scmp.ne.s32.totalorder %s2738_s13, %s2346_s18  ;;  %p2354_p1 = scmp.lt.s32.totalorder %s2352_s22, %s2346_s18 }
  0x22   : > { %2168 = vmatmul.mubr.msk.f32.gmra.mrb[4].mxu0 %vm380_vm0, %v375_v17 }
  0x23   : > { %2170 = vmatprep.mubr.msk.f32.mxu0 %vm380_vm0, %v376_v19  ;;  %335 = vadd.xlane.f32.xlu0 %v334_v20  ;;  %p2348_p12 = pnand %p2347_p11, %p2493_p5  ;;  %p2355_p2 = por %p2354_p1, %p2353_p0 }
  0x24   : > { %338 = vadd.xlane.f32.xlu1 %v337_v21 }
  0x25   : > { %p2349_p13 = pneg %p2348_p12 }
  0x26   : > { %2171 = vmatmul.mubr.msk.f32.gmra.mrb[6].mxu0 %vm380_vm0, %v377_v23 }
  0x27   : > { %341 = vadd.xlane.f32.xlu0 %v340_v25  ;;  %2200 = vmatprep.mubr.msk.f32.mxu0 %vm2411_vm2, %v2410_v27  ;;  %p2356_p3 = pnand %p2355_p2, %p2349_p13 }
  0x28   : > { %344 = vadd.xlane.f32.xlu1 %v343_v26 }
  0xa8   : > { %v324_v29 = vpop.xlane.xlu0 %323 }
  0xa9   : > { %v330_v28 = vpop.xlane.xlu1 %329  ;;  %2328 = vrcp.f32 %v324_v29 }
  0xac   : > { %v327_v31 = vpop.xlane.xlu0 %326 }
  0xad   : > { %v333_v30 = vpop.xlane.xlu1 %332  ;;  %2330 = vrcp.f32 %v327_v31 }
  0xb0   : > { %v336_v35 = vpop.xlane.xlu0 %335 }
  0xb1   : > { %v339_v32 = vpop.xlane.xlu1 %338 }
  0xb2   : > { %2332 = vrcp.f32 %v339_v32 }
  0xb3   : > { %2334 = vrcp.f32 %v330_v28  ;;  %v2329_v34 = vpop.eup %2328 }
  0xb4   : > { %v2570_v36 = vmul.f32 %v2329_v34, %v313_v7  ;;  %v342_v42 = vpop.xlane.xlu0 %341 }
  0xb5   : > { %v345_v33 = vpop.xlane.xlu1 %344 }
  0xb6   : > { %2336 = vrcp.f32 %v345_v33 }
  0xb7   : > { %2338 = vrcp.f32 %v333_v30  ;;  %v2331_v37 = vpop.eup %2330 }
  0xb8   : > { %2340 = vrcp.f32 %v336_v35  ;;  %v2572_v41 = vmul.f32 %v2331_v37, %v314_v9 }
  0xb9   : > { %2342 = vrcp.f32 %v342_v42 }
  0xbc   : > { %v2333_v40 = vpop.eup %2332 }
  0xbd   : > { %v2335_v43 = vpop.eup %2334  ;;  %v2580_v46 = vmul.f32 %v2333_v40, %v318_v18 }
  0xbe   : > { %v2583_v48 = vmul.f32 %v2335_v43, %v2531_v10 }
  0xc0   : > { %v2337_v47 = vpop.eup %2336 }
  0xc1   : > { %v2339_v49 = vpop.eup %2338  ;;  %v2590_v52 = vmul.f32 %v2337_v47, %v320_v24 }
  0xc2   : > { %v2596_v53 = vmul.f32 %v2339_v49, %v2534_v11  ;;  %v2341_v54 = vpop.eup %2340 }
  0xc3   : > { %v2615_v59 = vmul.f32 %v2341_v54, %v2544_v16  ;;  %v2343_v60 = vpop.eup %2342 }
  0xc4   : > { %v2625_v62 = vmul.f32 %v2343_v60, %v2555_v22 }
  0xed   : > { %v2163_v38 = vpop.f32.mrb[0].mxu0 }
  0xee   : > { %v471_v39 = vpop.f32.mrb[1].mxu0 }
  0xef   : > { %2174 = vmatpush3.msra.mxu1 %v471_v39 }
  0xf0   : > { %2176 = vmatmul.mubr.msk.f32.vlgmr.msra.gmra.mrb[0].mxu1 %vm321_vm1, %v2570_v36  ;;  %2178 = vmatprep.subr.mxu1 %v2410_v27 }
  0xf1   : > { %2179 = vmatpush3.msra.mxu1 %v2163_v38  ;;  %2180 = vmatprep.mubr.msk.f32.mxu1 %vm2411_vm2, %v2410_v27  ;;  %v2166_v44 = vpop.f32.mrb[2].mxu0 }
  0xf2   : > { %v481_v45 = vpop.f32.mrb[3].mxu0  ;;  %2183 = vmatprep.subr.mxu1 %v2410_v27 }
  0xf4   : > { %2181 = vmatmul.mubr.msk.f32.vlgmr.msra.gmra.mrb[2].mxu1 %vm321_vm1, %v2572_v41 }
  0xf5   : > { %2184 = vmatpush3.msra.mxu1 %v481_v45  ;;  %2185 = vmatprep.mubr.msk.f32.mxu1 %vm2411_vm2, %v2410_v27  ;;  %v2169_v50 = vpop.f32.mrb[4].mxu0 }
  0xf6   : > { %2188 = vmatprep.subr.mxu1 %v2410_v27  ;;  %v491_v51 = vpop.f32.mrb[5].mxu0  ;;  %2199 = vmatpush3.msra.mxu0 %v2169_v50 }
  0xf7   : > { %2201 = vmatmul.mubr.msk.f32.vlgmr.msra.gmra.mrb[8].mxu0 %vm321_vm1, %v2580_v46  ;;  %2208 = vmatprep.subr.mxu0 %v2410_v27 }
  0xf8   : > { %2186 = vmatmul.mubr.msk.f32.vlgmr.msra.gmra.mrb[4].mxu1 %vm321_vm1, %v2583_v48  ;;  %2210 = vmatprep.mubr.msk.f32.mxu0 %vm2411_vm2, %v2410_v27 }
  0xf9   : > { %2189 = vmatpush3.msra.mxu1 %v2166_v44  ;;  %2190 = vmatprep.mubr.msk.f32.mxu1 %vm2411_vm2, %v2410_v27  ;;  %v2172_v55 = vpop.f32.mrb[6].mxu0 }
  0xfa   : > { %2193 = vmatprep.subr.mxu1 %v2410_v27  ;;  %v501_v56 = vpop.f32.mrb[7].mxu0  ;;  %2209 = vmatpush3.msra.mxu0 %v2172_v55 }
  0xfb   : > { %2211 = vmatmul.mubr.msk.f32.vlgmr.msra.gmra.mrb[10].mxu0 %vm321_vm1, %v2590_v52  ;;  %2233 = vmatprep.subr.mxu0 %v2410_v27 }
  0xfc   : > { %2191 = vmatmul.mubr.msk.f32.vlgmr.msra.gmra.mrb[6].mxu1 %vm321_vm1, %v2596_v53  ;;  %2235 = vmatprep.mubr.msk.f32.mxu0 %vm2411_vm2, %v2410_v27 }
  0xfd   : > { %2194 = vmatpush3.msra.mxu1 %v491_v51  ;;  %2195 = vmatprep.mubr.msk.f32.mxu1 %vm2411_vm2, %v2410_v27 }
  0xfe   : > { %2203 = vmatprep.subr.mxu1 %v2410_v27 }
 0x100   : > { %2196 = vmatmul.mubr.msk.f32.vlgmr.msra.gmra.mrb[8].mxu1 %vm321_vm1, %v2615_v59 }
 0x101   : > { %2204 = vmatpush3.msra.mxu1 %v501_v56  ;;  %2205 = vmatprep.mubr.msk.f32.mxu1 %vm2411_vm2, %v2410_v27 }
 0x102   : > { %2278 = vmatprep.subr.bf16.mxu1 %v2277_v61 }
 0x104   : > { %2206 = vmatmul.mubr.msk.f32.vlgmr.msra.gmra.mrb[10].mxu1 %vm321_vm1, %v2625_v62 }
 0x105   : > { %2280 = vmatpush3.bf16.msra.mxu1 %v2277_v61 }
 0x106   : > { %2282 = vmatprep.subr.bf16.mxu1 %v2281_v1 }
 0x109   : > { %2284 = vmatpush3.bf16.msra.mxu1 %v2281_v1 }
 0x10a   : > { %2258 = vmatprep.subr.mxu1 %v2410_v27 }
 0x1c3   : > { %v579_v3 = vpop.f32.mrb[0].mxu1 }
 0x1c4   : > { %v1101_v4 = vadd.f32 %v2079_v2, %v579_v3  ;;  %v2177_v5 = vpop.f32.mrb[1].mxu1 }
 0x1c6   : > { %2221 = vmatprep.mubr.msk.f32.mxu1 %vm1113_vm3, %v1101_v4 }
 0x1c7   : > { %v652_v6 = vpop.f32.mrb[2].mxu1 }
 0x1c8   : > { %v1102_v7 = vadd.f32 %v2079_v2, %v652_v6  ;;  %v2182_v8 = vpop.f32.mrb[3].mxu1 }
 0x1ca   : > { %2222 = vmatmul.mubr.msk.f32.vlgmr.msra.gmra.mrb[12].mxu1 %vm1113_vm3, %v1102_v7  ;;  %v944_v9 = vpop.f32.mrb[8].mxu0 }
 0x1cb   : > { %v725_v10 = vpop.f32.mrb[4].mxu1  ;;  %v2202_v11 = vpop.f32.mrb[9].mxu0  ;;  %v1106_v20 = vadd.f32 %v2079_v2, %v944_v9 }
 0x1cc   : > { %v1103_v12 = vadd.f32 %v2079_v2, %v725_v10  ;;  %v2187_v13 = vpop.f32.mrb[5].mxu1 }
 0x1ce   : > { %2224 = vmatprep.mubr.msk.f32.mxu1 %vm1113_vm3, %v1103_v12  ;;  %v1090_v14 = vpop.f32.mrb[10].mxu0 }
 0x1cf   : > { %v798_v15 = vpop.f32.mrb[6].mxu1  ;;  %v2212_v16 = vpop.f32.mrb[11].mxu0  ;;  %v1108_v24 = vadd.f32 %v2079_v2, %v1090_v14 }
 0x1d0   : > { %v1104_v17 = vadd.f32 %v2079_v2, %v798_v15  ;;  %v2192_v18 = vpop.f32.mrb[7].mxu1 }
 0x1d2   : > { %2225 = vmatmul.mubr.msk.f32.gmra.mrb[14].mxu1 %vm1113_vm3, %v1104_v17 }
 0x1d3   : > { %v871_v19 = vpop.f32.mrb[8].mxu1 }
 0x1d4   : > { %v1105_v21 = vadd.f32 %v2079_v2, %v871_v19  ;;  %v2197_v22 = vpop.f32.mrb[9].mxu1 }
 0x1d6   : > { %2227 = vmatprep.mubr.msk.f32.mxu1 %vm1113_vm3, %v1105_v21 }
 0x1d7   : > { %v1017_v23 = vpop.f32.mrb[10].mxu1  ;;  %2228 = vmatmul.mubr.msk.f32.gmra.mrb[16].mxu1 %vm1113_vm3, %v1106_v20 }
 0x1d8   : > { %v1107_v25 = vadd.f32 %v2079_v2, %v1017_v23  ;;  %v2207_v26 = vpop.f32.mrb[11].mxu1 }
 0x1da   : > { %2230 = vmatprep.mubr.msk.f32.mxu1 %vm1113_vm3, %v1107_v25 }
 0x1db   : > { %2231 = vmatmul.mubr.msk.f32.gmra.mrb[18].mxu1 %vm1113_vm3, %v1108_v24 }
 0x1dc   : > { %2260 = vmatprep.mubr.msk.f32.mxu1 %vm2411_vm2, %v2410_v27 }
 0x29d   : > { %v2223_v28 = vpop.f32.mrb[12].mxu1 }
 0x29e   : > { %v1204_v29 = vpop.f32.mrb[13].mxu1 }
 0x29f   : > { %2234 = vmatpush3.msra.mxu0 %v1204_v29 }
 0x2a0   : > { %2236 = vmatmul.mubr.msk.f32.vlgmr.msra.gmra.mrb[12].mxu0 %vm321_vm1, %v2570_v36  ;;  %2238 = vmatprep.subr.mxu0 %v2410_v27  ;;  %v2693_v36 = vld [vmem:[%s2793_s5] ss:$0 sm:$0xff] }
 0x2a1   : > { %2239 = vmatpush3.msra.mxu0 %v2223_v28  ;;  %2240 = vmatprep.mubr.msk.f32.mxu0 %vm2411_vm2, %v2410_v27 }
 0x2a2   : > { %2243 = vmatprep.subr.mxu0 %v2410_v27 }
 0x2a4   : > { %2241 = vmatmul.mubr.msk.f32.vlgmr.msra.gmra.mrb[14].mxu0 %vm321_vm1, %v2572_v41 }
 0x2a5   : > { %v2226_v30 = vpop.f32.mrb[14].mxu1  ;;  %2245 = vmatprep.mubr.msk.f32.mxu0 %vm2411_vm2, %v2410_v27 }
 0x2a6   : > { %v1214_v31 = vpop.f32.mrb[15].mxu1 }
 0x2a7   : > { %2244 = vmatpush3.msra.mxu0 %v1214_v31 }
 0x2a8   : > { %2246 = vmatmul.mubr.msk.f32.vlgmr.msra.gmra.mrb[16].mxu0 %vm321_vm1, %v2583_v48  ;;  %2248 = vmatprep.subr.mxu0 %v2410_v27 }
 0x2a9   : > { %2249 = vmatpush3.msra.mxu0 %v2226_v30  ;;  %2250 = vmatprep.mubr.msk.f32.mxu0 %vm2411_vm2, %v2410_v27 }
 0x2aa   : > { %v2229_v32 = vpop.f32.mrb[16].mxu1  ;;  %2253 = vmatprep.subr.mxu0 %v2410_v27 }
 0x2ab   : > { %v1224_v33 = vpop.f32.mrb[17].mxu1  ;;  %2259 = vmatpush3.msra.mxu1 %v2229_v32 }
 0x2ac   : > { %2251 = vmatmul.mubr.msk.f32.vlgmr.msra.gmra.mrb[18].mxu0 %vm321_vm1, %v2596_v53  ;;  %2261 = vmatmul.mubr.msk.f32.vlgmr.msra.gmra.mrb[20].mxu1 %vm321_vm1, %v2580_v46 }
 0x2ad   : > { %2254 = vmatpush3.msra.mxu0 %v1224_v33  ;;  %2268 = vmatprep.subr.mxu1 %v2410_v27 }
 0x2ae   : > { %v2232_v34 = vpop.f32.mrb[18].mxu1  ;;  %2255 = vmatprep.mubr.msk.f32.mxu0 %vm2411_vm2, %v2410_v27  ;;  %2270 = vmatprep.mubr.msk.f32.mxu1 %vm2411_vm2, %v2410_v27 }
 0x2af   : > { %2269 = vmatpush3.msra.mxu1 %v2232_v34  ;;  %v1234_v35 = vpop.f32.mrb[19].mxu1  ;;  %2263 = vmatprep.subr.mxu0 %v2410_v27 }
 0x2b0   : > { %2256 = vmatmul.mubr.msk.f32.vlgmr.msra.gmra.mrb[20].mxu0 %vm321_vm1, %v2615_v59  ;;  %2271 = vmatmul.mubr.msk.f32.vlgmr.msra.gmra.mrb[22].mxu1 %vm321_vm1, %v2590_v52 }
 0x2b1   : > { %2264 = vmatpush3.msra.mxu0 %v1234_v35  ;;  %2265 = vmatprep.mubr.msk.f32.mxu0 %vm2411_vm2, %v2410_v27 }
 0x2b4   : > { %2266 = vmatmul.mubr.msk.f32.vlgmr.msra.gmra.mrb[22].mxu0 %vm321_vm1, %v2625_v62 }
 0x373   : > { %v1309_v37 = vpop.f32.mrb[12].mxu0 }
 0x374   : > { %v1810_v38 = vadd.f32 %v2693_v36, %v1309_v37  ;;  %v2237_v39 = vpop.f32.mrb[13].mxu0 }
 0x376   : > { %1818 = vst.msk [vmem:[%s2696_s8] sm:$0xff] %vm380_vm0, %v1810_v38  ;;  %v1826_v27 = vsel %vm380_vm0, %v1810_v38, 0.0 }
 0x377   : > { %v1827_v40 = vrot.slane %v1826_v27, 4  ;;  %v1379_v41 = vpop.f32.mrb[14].mxu0 }
 0x378   : > { %v1811_v42 = vadd.f32 %v2693_v36, %v1379_v41  ;;  %v2242_v43 = vpop.f32.mrb[15].mxu0 }
 0x379   : > { %v1828_v44 = vadd.f32 %v1827_v40, %v1826_v27 }
 0x37a   : > { %1819 = vst.msk [vmem:[%s2696_s8 + $0x8] sm:$0xff] %vm380_vm0, %v1811_v42  ;;  %v1833_v45 = vsel %vm380_vm0, %v1811_v42, 0.0 }
 0x37b   : > { %v1829_v46 = vrot.slane %v1828_v44, 2  ;;  %v1834_v47 = vrot.slane %v1833_v45, 4  ;;  %v1449_v48 = vpop.f32.mrb[16].mxu0 }
 0x37c   : > { %v1812_v49 = vadd.f32 %v2693_v36, %v1449_v48  ;;  %v2247_v50 = vpop.f32.mrb[17].mxu0 }
 0x37d   : > { %v1830_v51 = vadd.f32 %v1829_v46, %v1828_v44  ;;  %v1835_v52 = vadd.f32 %v1834_v47, %v1833_v45 }
 0x37e   : > { %1820 = vst.msk [vmem:[%s2696_s8 + $0x10] sm:$0xff] %vm380_vm0, %v1812_v49  ;;  %v1840_v53 = vsel %vm380_vm0, %v1812_v49, 0.0 }
 0x37f   : > { %v1831_v54 = vrot.slane %v1830_v51, 1  ;;  %v1836_v55 = vrot.slane %v1835_v52, 2  ;;  %v1841_v56 = vrot.slane %v1840_v53, 4  ;;  %v1519_v57 = vpop.f32.mrb[18].mxu0  ;;  %v1659_v58 = vpop.f32.mrb[20].mxu1 }
 0x380   : > { %v1813_v59 = vadd.f32 %v2693_v36, %v1519_v57  ;;  %v1815_v60 = vadd.f32 %v2693_v36, %v1659_v58  ;;  %v2252_v61 = vpop.f32.mrb[19].mxu0  ;;  %v2262_v62 = vpop.f32.mrb[21].mxu1 }
 0x381   : > { %v1832_v63 = vadd.f32 %v1831_v54, %v1830_v51  ;;  %v1837_v0 = vadd.f32 %v1836_v55, %v1835_v52  ;;  %v1842_v1 = vadd.f32 %v1841_v56, %v1840_v53 }
 0x382   : > { %1821 = vst.msk [vmem:[%s2696_s8 + $0x18] sm:$0xff] %vm380_vm0, %v1813_v59  ;;  %v1847_v2 = vsel %vm380_vm0, %v1813_v59, 0.0  ;;  %1823 = vst.msk [vmem:[%s2696_s8 + $0x28] sm:$0xff] %vm380_vm0, %v1815_v60  ;;  %v1861_v3 = vsel %vm380_vm0, %v1815_v60, 0.0 }
 0x383   : > { %v1838_v4 = vrot.slane %v1837_v0, 1  ;;  %v1843_v5 = vrot.slane %v1842_v1, 2  ;;  %v1848_v6 = vrot.slane %v1847_v2, 4  ;;  %v1589_v7 = vpop.f32.mrb[20].mxu0  ;;  %v1799_v8 = vpop.f32.mrb[22].mxu1  ;;  %v1883_v9 = vmul.f32 0.125, %v1832_v63 }
 0x384   : > { %v1862_v10 = vrot.slane %v1861_v3, 4  ;;  %v1814_v11 = vadd.f32 %v2693_v36, %v1589_v7  ;;  %v1817_v12 = vadd.f32 %v2693_v36, %v1799_v8  ;;  %v2257_v13 = vpop.f32.mrb[21].mxu0  ;;  %v2272_v14 = vpop.f32.mrb[23].mxu1 }
 0x385   : > { %v1839_v15 = vadd.f32 %v1838_v4, %v1837_v0  ;;  %v1844_v16 = vadd.f32 %v1843_v5, %v1842_v1  ;;  %v1849_v17 = vadd.f32 %v1848_v6, %v1847_v2  ;;  %v1891_v26 = vmul.f32 %v1883_v9, %v1883_v9 }
 0x386   : > { %v1863_v18 = vadd.f32 %v1862_v10, %v1861_v3  ;;  %1822 = vst.msk [vmem:[%s2696_s8 + $0x20] sm:$0xff] %vm380_vm0, %v1814_v11  ;;  %v1854_v19 = vsel %vm380_vm0, %v1814_v11, 0.0  ;;  %1825 = vst.msk [vmem:[%s2696_s8 + $0x38] sm:$0xff] %vm380_vm0, %v1817_v12  ;;  %v1875_v20 = vsel %vm380_vm0, %v1817_v12, 0.0 }
 0x387   : > { %v1884_v21 = vmul.f32 0.125, %v1839_v15  ;;  %v1845_v22 = vrot.slane %v1844_v16, 1  ;;  %v1850_v23 = vrot.slane %v1849_v17, 2  ;;  %v1855_v24 = vrot.slane %v1854_v19, 4  ;;  %v1729_v25 = vpop.f32.mrb[22].mxu0 }
 0x388   : > { %v1864_v28 = vrot.slane %v1863_v18, 2  ;;  %v1876_v29 = vrot.slane %v1875_v20, 4  ;;  %v1816_v30 = vadd.f32 %v2693_v36, %v1729_v25  ;;  %v2267_v31 = vpop.f32.mrb[23].mxu0 }
 0x389   : > { %v1892_v32 = vmul.f32 %v1884_v21, %v1884_v21  ;;  %v1846_v33 = vadd.f32 %v1845_v22, %v1844_v16  ;;  %v1851_v34 = vadd.f32 %v1850_v23, %v1849_v17  ;;  %v1856_v35 = vadd.f32 %v1855_v24, %v1854_v19 }
 0x38a   : > { %v1865_v37 = vadd.f32 %v1864_v28, %v1863_v18  ;;  %v1877_v38 = vadd.f32 %v1876_v29, %v1875_v20  ;;  %1824 = vst.msk [vmem:[%s2696_s8 + $0x30] sm:$0xff] %vm380_vm0, %v1816_v30  ;;  %v1868_v39 = vsel %vm380_vm0, %v1816_v30, 0.0 }
 0x38b   : > { %v1908_v27 = vsel %vm1907_vm4, %v1892_v32, %v1891_v26  ;;  %v1885_v40 = vmul.f32 0.125, %v1846_v33  ;;  %v1852_v41 = vrot.slane %v1851_v34, 1  ;;  %v1857_v42 = vrot.slane %v1856_v35, 2 }
 0x38c   : > { %v1866_v43 = vrot.slane %v1865_v37, 1  ;;  %v1878_v44 = vrot.slane %v1877_v38, 2  ;;  %v1869_v45 = vrot.slane %v1868_v39, 4 }
 0x38d   : > { %v1893_v36 = vmul.f32 %v1885_v40, %v1885_v40  ;;  %v1853_v46 = vadd.f32 %v1852_v41, %v1851_v34  ;;  %v1858_v47 = vadd.f32 %v1857_v42, %v1856_v35 }
 0x38e   : > { %v1867_v48 = vadd.f32 %v1866_v43, %v1865_v37  ;;  %v1879_v49 = vadd.f32 %v1878_v44, %v1877_v38  ;;  %v1870_v50 = vadd.f32 %v1869_v45, %v1868_v39 }
 0x38f   : > { %v1886_v51 = vmul.f32 0.125, %v1853_v46  ;;  %v1859_v52 = vrot.slane %v1858_v47, 1  ;;  %v1910_v53 = vsel %vm1909_vm5, %v1893_v36, %v1908_v27 }
 0x390   : > { %v1880_v54 = vrot.slane %v1879_v49, 1  ;;  %v1871_v55 = vrot.slane %v1870_v50, 2  ;;  %v1888_v58 = vmul.f32 0.125, %v1867_v48 }
 0x391   : > { %v1894_v56 = vmul.f32 %v1886_v51, %v1886_v51  ;;  %v1860_v57 = vadd.f32 %v1859_v52, %v1858_v47 }
 0x392   : > { %v1872_v59 = vadd.f32 %v1871_v55, %v1870_v50  ;;  %v1881_v61 = vadd.f32 %v1880_v54, %v1879_v49  ;;  %v1896_v1 = vmul.f32 %v1888_v58, %v1888_v58 }
 0x393   : > { %v1887_v60 = vmul.f32 0.125, %v1860_v57  ;;  %v1912_v62 = vsel %vm1911_vm6, %v1894_v56, %v1910_v53 }
 0x394   : > { %v1873_v63 = vrot.slane %v1872_v59, 1  ;;  %v1890_v3 = vmul.f32 0.125, %v1881_v61 }
 0x395   : > { %v1895_v0 = vmul.f32 %v1887_v60, %v1887_v60 }
 0x396   : > { %v1874_v2 = vadd.f32 %v1873_v63, %v1872_v59  ;;  %v1898_v8 = vmul.f32 %v1890_v3, %v1890_v3 }
 0x397   : > { %v1914_v4 = vsel %vm1913_vm7, %v1895_v0, %v1912_v62 }
 0x398   : > { %v1889_v5 = vmul.f32 0.125, %v1874_v2  ;;  %v1916_v6 = vsel %vm1915_vm8, %v1896_v1, %v1914_v4 }
 0x39a   : > { %v1897_v7 = vmul.f32 %v1889_v5, %v1889_v5 }
 0x39c   : > { %v1918_v9 = vsel %vm1917_vm9, %v1897_v7, %v1916_v6 }
 0x39d   : > { %v1920_v10 = vsel %vm1919_vm10, %v1898_v8, %v1918_v9 }
 0x39e   : > { %v1922_v11 = vsel %vm380_vm0, %v1920_v10, 0.0 }
 0x39f   : > { %1923 = vadd.xlane.f32.xlu0 %v1922_v11 }
 0x3a0   : > { %2359 = shalt.err (!%p2356_p3)
}
 0x3a1   : > { %s2360_s21 = scalar_lea.hbm %s2736_s16, 1024  ;;  %s2364_s8 = scalar_lea.hbm %s2794_s6, 2048 }
 0x3a2   : > { %p2361_p4 = scmp.ne.s32.totalorder %s2736_s16, %s2360_s21  ;;  %p2365_p9 = scmp.lt.u32.totalorder %s2736_s16, %s2794_s6 }
 0x3a3   : > { %p2366_p10 = scmp.lt.u32.totalorder %s2364_s8, %s2360_s21  ;;  %p2368_p12 = scmp.lt.u32.totalorder %s2360_s21, %s2736_s16 }
 0x3a4   : > { %p2362_p7 = pnand %p2361_p4, %p2493_p5 }
 0x3a5   : > { %p2367_p11 = por %p2366_p10, %p2365_p9 }
 0x3a6   : > { %p2363_p8 = pneg %p2362_p7 }
 0x3a7   : > { %p2369_p13 = por %p2368_p12, %p2367_p11 }
 0x3a9   : > { %p2370_p0 = pnand %p2369_p13, %p2363_p8 }
 0x3ab   : > { %2373 = shalt.err (!%p2370_p0)
}
 0x3ac   : > { %s2413_s15 = smov 128   ;;  %s2414_s18 = smov 8   ;;  %vm1932_vm11 = vcmask 7168  }
 0x3ad   : > { %2285 = dma.vmem_to_hbm [thread:$0]  (%p2493_p5), %s2738_s13, 1024, %s2736_s16, %s2742_s17, %s2413_s15, %s2413_s15, %s2414_s18  }
 0x3ae   : > { %p309_p1 = scmp.lt.s32.totalorder %s2476_s28, 1 }
 0x3b0   : > { %s2805_s28 = smov (!%p309_p1, %s2476_s28), 1 }
 0x3b1   : > { %s2062_s19 = sshll.u32 %s2805_s28, 3 }
 0x3b2   : > { %s312_s21 = scalar_lea.vmem %s2795_s7, %s2062_s19 }
 0x42c   : > { %v1924_v12 = vpop.xlane.xlu0 %1923 }
 0x42d   : > { %2344 = vrsqrt.f32 %v1924_v12  ;;  %vm1927_vm12 = vcmp.eq.f32.partialorder %v1924_v12, inf  ;;  %v1930_v15 = vand.u32 2147483648, %v1924_v12  ;;  %vm1929_vm13 = vcmp.eq.f32.partialorder %v1924_v12, 0.0 }
 0x437   : > { %v2345_v13 = vpop.eup %2344 }
 0x438   : > { %v1926_v14 = vmul.f32 %v2345_v13, %v1924_v12 }
 0x43a   : > { %v1928_v16 = vsel %vm1927_vm12, %v1924_v12, %v1926_v14 }
 0x43b   : > { %v1931_v17 = vsel %vm1929_vm13, %v1930_v15, %v1928_v16 }
 0x43c   : > { %1933 = vst.msk [vmem:[%s312_s21] sm:$0xff] %vm1932_vm11, %v1931_v17 }
 0x43d PF: > { %p2291_p5 = scmp.ge.s32.totalorder %s2408_s27, 2  ;;  %s1970_s11 = sand.u32 1, %s2396_s24  }
 0x43e   : > { %s1971_s28 = scalar_lea.sflag [#allocation3], %s1970_s11 }
 0x43f   : > { %p2288_p2 = pnand %p2291_p5, %p2497_p6 }
 0x441   : > { %2391 = dma.done.wait (!%p2288_p2), %s1971_s28, 1024  }
 0x442   : > { %2393 = vsyncadd (!%p2288_p2), %s1971_s28, 4294966272  ;;  %p18_p3 = scmp.ge.s32.totalorder %s2480_s30, 4   ;;  %s2798_s24 = smov %s2400_s25 }
 0x443   : > { %s2799_s25 = smov %s2404_s26  ;;  %s2800_s26 = smov %s2491_s10 }
 0x444   : > { %s2801_s27 = smov %s2480_s30  ;;  %20 = sbr.rel (!%p18_p3) target bundleno = 3 (0x3), region = 94 }
 0x44b   :  { %1983 = vsyncpa [#allocation3], 1 }
 0x44c   :  { %1985 = vsyncpa [#allocation3 + $0x1], 1 }

</bundles_post_ra>
